<compile_context>
chip_gen: v6e
topology: v6e:2x2x1
jax: 0.10.0
libtpu: 0.0.40
codegen_flags: <defaults>
</compile_context>

<pallas_src>
import functools

import jax
import jax.numpy as jnp
from jax.experimental import pallas as pl
from jax.experimental.pallas import tpu as pltpu

LANE = 128           # TPU lane width
SUBLANE_BF16 = 16    # bf16 sublane packing


def _round_up(x, m):
    return ((x + m - 1) // m) * m


# ----------------------------- Pallas kernel ------------------------------ #

def _fused_mlp_kernel(x_ref, w_ref, b_ref, o_ref, *, layer_rows, relu_flags):
    """Whole BuildnetEnc_Node stack on one node tile.

    x_ref : (tile, K0)        f32 node-feature tile
    w_ref : (sum(rows), NPAD) bf16 packed, folded weights (row-stacked)
    b_ref : (L, NPAD)         f32 packed, folded biases
    o_ref : (tile, NPAD)      f32 output tile (lane-dense)
    """
    h = x_ref[...]                                    # (tile, K0) f32
    b_all = b_ref[...]                                # small: L x NPAD
    off = 0
    for li, k_rows in enumerate(layer_rows):          # unrolled at trace time
        w = w_ref[off:off + k_rows, :]                # (k_rows, NPAD) bf16
        b = b_all[li:li + 1, :]                       # (1, NPAD) f32
        acc = jnp.dot(h.astype(jnp.bfloat16), w,
                      preferred_element_type=jnp.float32) + b
        h = jnp.maximum(acc, 0.0) if relu_flags[li] else acc
        off += k_rows
    o_ref[...] = h.astype(o_ref.dtype)


# ------------------------------- Wrapper ----------------------------------- #

def buildnet_enc_node_forward(input_features, params, *, tile_m=2048):
    """Fused forward: one pallas_call for the whole BuildnetEnc_Node stack."""
    w_buf, b_buf, layer_rows, relu_flags, out_dim = params
    M, K = input_features.shape
    K0 = layer_rows[0]                 # first-layer row count (padded in_c)
    n_pad = w_buf.shape[1]             # lane-dense width of every layer

    x = input_features
    if K0 != K:                                    # pad feature dim (zeros)
        x = jnp.pad(x, ((0, 0), (0, K0 - K)))

    # Node tile: as large as possible (amortize per-step overhead) but always
    # >= 2 grid steps so v7x can shard the "parallel" axis across its 2 TCs.
    M8 = _round_up(M, 8)
    tile = min(tile_m, M8)
    if M8 >= 16:
        tile = min(tile, _round_up((M8 + 1) // 2, 8))
    M_pad = _round_up(M, tile)
    if M_pad != M:                                 # pad node dim (zeros)
        x = jnp.pad(x, ((0, M_pad - M), (0, 0)))

    flops = 2 * M_pad * sum(k * n_pad for k in layer_rows)
    bytes_accessed = (x.size * 4 + w_buf.size * 2 + b_buf.size * 4
                      + M_pad * n_pad * 4)

    kernel = functools.partial(_fused_mlp_kernel,
                               layer_rows=tuple(layer_rows),
                               relu_flags=tuple(relu_flags))
    out = pl.pallas_call(
        kernel,
        out_shape=jax.ShapeDtypeStruct((M_pad, n_pad), jnp.float32),
        grid=(M_pad // tile,),
        in_specs=[
            pl.BlockSpec((tile, K0), lambda i: (i, 0)),        # node tile
            pl.BlockSpec(w_buf.shape, lambda i: (0, 0)),       # resident W
            pl.BlockSpec(b_buf.shape, lambda i: (0, 0)),       # resident b
        ],
        out_specs=pl.BlockSpec((tile, n_pad), lambda i: (i, 0)),
        compiler_params=pltpu.CompilerParams(
            dimension_semantics=("parallel",)),
        cost_estimate=pl.CostEstimate(flops=flops, transcendentals=0,
                                      bytes_accessed=bytes_accessed),
    )(x, w_buf, b_buf)
    return out[:M, :out_dim]


# --------------------------- Parameter creation ---------------------------- #

def init_gnn_node_params(key, in_c, hid_c, out_c, num_hidden):
    """Params for one GNN_Node MLP update, BatchNorm folded into W/b (f32)."""
    dims = [in_c] + [hid_c] * num_hidden + [out_c]
    layers = []
    eps = 1e-5
    for li in range(len(dims) - 1):
        key, k_w, k_b, k_g, k_be = jax.random.split(key, 5)
        fan_in, fan_out = dims[li], dims[li + 1]
        bound = 1.0 / (fan_in ** 0.5)
        w = jax.random.uniform(k_w, (fan_in, fan_out), jnp.float32,
                               -bound, bound)
        b = jax.random.uniform(k_b, (1, fan_out), jnp.float32, -bound, bound)
        gamma = 1.0 + 0.1 * jax.random.normal(k_g, (1, fan_out), jnp.float32)
        beta = 0.1 * jax.random.normal(k_be, (1, fan_out), jnp.float32)
        # Eval-mode BN fold with the module's running statistics (fresh BN
        # here: mean=0, var=1 — substitute trained stats for a checkpoint).
        running_mean = jnp.zeros((1, fan_out), jnp.float32)
        running_var = jnp.ones((1, fan_out), jnp.float32)
        scale = gamma / jnp.sqrt(running_var + eps)
        shift = beta - running_mean * scale
        w_folded = w * scale                      # f32 fold
        b_folded = b * scale + shift
        apply_relu = li < len(dims) - 2           # ReLU on all but last linear
        layers.append((w_folded, b_folded, apply_relu))
    return layers, key


def init_buildnet_enc_node_params(key, mlp_channels):
    """mlp_channels: list of (in_channel, hidden_channel, out_channel, num_hidden)."""
    fused_layers = []
    for (in_c, hid_c, out_c, num_hidden) in mlp_channels:
        layers, key = init_gnn_node_params(key, in_c, hid_c, out_c, num_hidden)
        fused_layers.extend(layers)
    return fused_layers


def pack_fused_layers(fused_layers):
    """Pad every layer to a common lane-dense width, cast weights to bf16
    (AFTER the f32 BN fold) and pack everything into two resident buffers."""
    n_pad = max(_round_up(w.shape[1], LANE) for (w, _, _) in fused_layers)
    in_c = fused_layers[0][0].shape[0]
    k0 = _round_up(in_c, SUBLANE_BF16)   # keep weight-row slices 16-aligned

    layer_rows, relu_flags, w_blocks, b_rows = [], [], [], []
    for li, (w, b, relu) in enumerate(fused_layers):
        k, n = w.shape
        k_rows = k0 if li == 0 else n_pad
        w_p = jnp.zeros((k_rows, n_pad), jnp.float32).at[:k, :n].set(w)
        b_p = jnp.zeros((1, n_pad), jnp.float32).at[:, :n].set(b)
        w_blocks.append(w_p.astype(jnp.bfloat16))    # cast last (precision)
        b_rows.append(b_p)                           # bias stays f32
        layer_rows.append(k_rows)
        relu_flags.append(bool(relu))

    w_buf = jnp.concatenate(w_blocks, axis=0)        # (sum rows, n_pad) bf16
    b_buf = jnp.concatenate(b_rows, axis=0)          # (L, n_pad) f32
    out_dim = fused_layers[-1][0].shape[1]
    return (w_buf, b_buf, tuple(layer_rows), tuple(relu_flags), out_dim)


# --------------------------------- Main ------------------------------------ #

if __name__ == "__main__":
    key = jax.random.PRNGKey(0)

    # modelmeta.mlp_channels analogue: two GNN_Node updates.
    #   update 0: in=16, hidden=32, out=32, num_hidden=2
    #   update 1: in=32, hidden=32, out=16, num_hidden=1
    mlp_channels = [(16, 32, 32, 2), (32, 32, 16, 1)]

    key, k_in = jax.random.split(key)
    num_nodes, in_channel = 64, mlp_channels[0][0]
    input_features = jax.random.normal(k_in, (num_nodes, in_channel),
                                       jnp.float32)

    fused_layers = init_buildnet_enc_node_params(jax.random.PRNGKey(42),
                                                 mlp_channels)
    params = pack_fused_layers(fused_layers)

    out = buildnet_enc_node_forward(input_features, params)
    out = jax.block_until_ready(out)
    assert out.shape == (num_nodes, mlp_channels[-1][2])

    # Pure-JAX reference of the folded f32 stack (kernel uses bf16 weights,
    # so compare with a loose relative tolerance).
    ref = input_features
    for (w, b, relu) in fused_layers:
        ref = ref @ w + b
        if relu:
            ref = jnp.maximum(ref, 0.0)
    max_err = float(jnp.max(jnp.abs(out - ref)))
    tol = 5e-2 * float(jnp.maximum(1.0, jnp.max(jnp.abs(ref)))) + 1e-2
    assert max_err < tol, (max_err, tol)

    print("KERNEL_OK")
</pallas_src>

<mosaic_0001>
module attributes {stable_mosaic.version = 11 : i64} {
  func.func @_fused_mlp_kernel(%arg0: i32, %arg1: memref<32x16xf32, #tpu.memory_space<vmem>>, %arg2: memref<528x128xbf16, #tpu.memory_space<vmem>>, %arg3: memref<5x128xf32, #tpu.memory_space<vmem>>, %arg4: memref<32x128xf32, #tpu.memory_space<vmem>>) attributes {dimension_semantics = [#tpu.dimension_semantics<parallel>], iteration_bounds = array<i64: 2>, scalar_prefetch = 0 : i64, scratch_operands = 0 : i64, tpu.core_type = #tpu.core_type<tc>, window_params = [{transform_indices = @transform_0, window_bounds = array<i64: 32, 16>}, {pipeline_mode = #tpu.pipeline_mode<synchronous>, transform_indices = @transform_1, window_bounds = array<i64: 528, 128>}, {pipeline_mode = #tpu.pipeline_mode<synchronous>, transform_indices = @transform_2, window_bounds = array<i64: 5, 128>}, {transform_indices = @transform_3, window_bounds = array<i64: 32, 128>}]} {
    %c0 = arith.constant 0 : index
    %c0_0 = arith.constant 0 : index
    %0 = vector.load %arg1[%c0, %c0_0] : memref<32x16xf32, #tpu.memory_space<vmem>>, vector<32x16xf32>
    %c0_1 = arith.constant 0 : index
    %c0_2 = arith.constant 0 : index
    %1 = vector.load %arg3[%c0_1, %c0_2] : memref<5x128xf32, #tpu.memory_space<vmem>>, vector<5x128xf32>
    %c0_3 = arith.constant 0 : index
    %c0_4 = arith.constant 0 : index
    %2 = vector.load %arg2[%c0_3, %c0_4] : memref<528x128xbf16, #tpu.memory_space<vmem>>, vector<16x128xbf16>
    %3 = vector.extract_strided_slice %1 {offsets = [0, 0], sizes = [1, 128], strides = [1, 1]} : vector<5x128xf32> to vector<1x128xf32>
    %4 = arith.truncf %0 : vector<32x16xf32> to vector<32x16xbf16>
    %cst = arith.constant dense<0.000000e+00> : vector<32x128xf32>
    %5 = tpu.matmul %4, %2, %cst {dimension_numbers = #tpu.dot_dimension_numbers<[1], [0], [0], [1], [0, 0, 1, 1], [], []>} : vector<32x16xbf16>, vector<16x128xbf16>, vector<32x128xf32> -> vector<32x128xf32>
    %6 = vector.broadcast %3 : vector<1x128xf32> to vector<32x128xf32>
    %7 = arith.addf %5, %6 : vector<32x128xf32>
    %cst_5 = arith.constant 0.000000e+00 : f32
    %8 = vector.broadcast %cst_5 : f32 to vector<32x128xf32>
    %9 = arith.maximumf %7, %8 : vector<32x128xf32>
    %c16 = arith.constant 16 : index
    %c0_6 = arith.constant 0 : index
    %10 = vector.load %arg2[%c16, %c0_6] : memref<528x128xbf16, #tpu.memory_space<vmem>>, vector<128x128xbf16>
    %11 = vector.extract_strided_slice %1 {offsets = [1, 0], sizes = [1, 128], strides = [1, 1]} : vector<5x128xf32> to vector<1x128xf32>
    %12 = arith.truncf %9 : vector<32x128xf32> to vector<32x128xbf16>
    %cst_7 = arith.constant dense<0.000000e+00> : vector<32x128xf32>
    %13 = tpu.matmul %12, %10, %cst_7 {dimension_numbers = #tpu.dot_dimension_numbers<[1], [0], [0], [1], [0, 0, 1, 1], [], []>} : vector<32x128xbf16>, vector<128x128xbf16>, vector<32x128xf32> -> vector<32x128xf32>
    %14 = vector.broadcast %11 : vector<1x128xf32> to vector<32x128xf32>
    %15 = arith.addf %13, %14 : vector<32x128xf32>
    %cst_8 = arith.constant 0.000000e+00 : f32
    %16 = vector.broadcast %cst_8 : f32 to vector<32x128xf32>
    %17 = arith.maximumf %15, %16 : vector<32x128xf32>
    %c144 = arith.constant 144 : index
    %c0_9 = arith.constant 0 : index
    %18 = vector.load %arg2[%c144, %c0_9] : memref<528x128xbf16, #tpu.memory_space<vmem>>, vector<128x128xbf16>
    %19 = vector.extract_strided_slice %1 {offsets = [2, 0], sizes = [1, 128], strides = [1, 1]} : vector<5x128xf32> to vector<1x128xf32>
    %20 = arith.truncf %17 : vector<32x128xf32> to vector<32x128xbf16>
    %cst_10 = arith.constant dense<0.000000e+00> : vector<32x128xf32>
    %21 = tpu.matmul %20, %18, %cst_10 {dimension_numbers = #tpu.dot_dimension_numbers<[1], [0], [0], [1], [0, 0, 1, 1], [], []>} : vector<32x128xbf16>, vector<128x128xbf16>, vector<32x128xf32> -> vector<32x128xf32>
    %22 = vector.broadcast %19 : vector<1x128xf32> to vector<32x128xf32>
    %23 = arith.addf %21, %22 : vector<32x128xf32>
    %c272 = arith.constant 272 : index
    %c0_11 = arith.constant 0 : index
    %24 = vector.load %arg2[%c272, %c0_11] : memref<528x128xbf16, #tpu.memory_space<vmem>>, vector<128x128xbf16>
    %25 = vector.extract_strided_slice %1 {offsets = [3, 0], sizes = [1, 128], strides = [1, 1]} : vector<5x128xf32> to vector<1x128xf32>
    %26 = arith.truncf %23 : vector<32x128xf32> to vector<32x128xbf16>
    %cst_12 = arith.constant dense<0.000000e+00> : vector<32x128xf32>
    %27 = tpu.matmul %26, %24, %cst_12 {dimension_numbers = #tpu.dot_dimension_numbers<[1], [0], [0], [1], [0, 0, 1, 1], [], []>} : vector<32x128xbf16>, vector<128x128xbf16>, vector<32x128xf32> -> vector<32x128xf32>
    %28 = vector.broadcast %25 : vector<1x128xf32> to vector<32x128xf32>
    %29 = arith.addf %27, %28 : vector<32x128xf32>
    %cst_13 = arith.constant 0.000000e+00 : f32
    %30 = vector.broadcast %cst_13 : f32 to vector<32x128xf32>
    %31 = arith.maximumf %29, %30 : vector<32x128xf32>
    %c400 = arith.constant 400 : index
    %c0_14 = arith.constant 0 : index
    %32 = vector.load %arg2[%c400, %c0_14] : memref<528x128xbf16, #tpu.memory_space<vmem>>, vector<128x128xbf16>
    %33 = vector.extract_strided_slice %1 {offsets = [4, 0], sizes = [1, 128], strides = [1, 1]} : vector<5x128xf32> to vector<1x128xf32>
    %34 = arith.truncf %31 : vector<32x128xf32> to vector<32x128xbf16>
    %cst_15 = arith.constant dense<0.000000e+00> : vector<32x128xf32>
    %35 = tpu.matmul %34, %32, %cst_15 {dimension_numbers = #tpu.dot_dimension_numbers<[1], [0], [0], [1], [0, 0, 1, 1], [], []>} : vector<32x128xbf16>, vector<128x128xbf16>, vector<32x128xf32> -> vector<32x128xf32>
    %36 = vector.broadcast %33 : vector<1x128xf32> to vector<32x128xf32>
    %37 = arith.addf %35, %36 : vector<32x128xf32>
    %c0_16 = arith.constant 0 : index
    %c0_17 = arith.constant 0 : index
    %38 = vector.load %arg4[%c0_16, %c0_17] : memref<32x128xf32, #tpu.memory_space<vmem>>, vector<32x128xf32>
    tpu.vector_store %arg4[%c0_16, %c0_17], %37 {strides = array<i32>} : memref<32x128xf32, #tpu.memory_space<vmem>>, vector<32x128xf32>,
    return
  }
  func.func @transform_0(%arg0: i32) -> (i32, i32) {
    %c0_i32 = arith.constant 0 : i32
    %c0_i32_0 = arith.constant 0 : i32
    return %arg0, %c0_i32 : i32, i32
  }
  func.func @transform_1(%arg0: i32) -> (i32, i32) {
    %c0_i32 = arith.constant 0 : i32
    %c0_i32_0 = arith.constant 0 : i32
    %c0_i32_1 = arith.constant 0 : i32
    return %c0_i32, %c0_i32_0 : i32, i32
  }
  func.func @transform_2(%arg0: i32) -> (i32, i32) {
    %c0_i32 = arith.constant 0 : i32
    %c0_i32_0 = arith.constant 0 : i32
    %c0_i32_1 = arith.constant 0 : i32
    return %c0_i32, %c0_i32_0 : i32, i32
  }
  func.func @transform_3(%arg0: i32) -> (i32, i32) {
    %c0_i32 = arith.constant 0 : i32
    %c0_i32_0 = arith.constant 0 : i32
    return %arg0, %c0_i32 : i32, i32
  }
}

</mosaic_0001>

<bundles_post_ra>
// kernel: tpu_custom_call.1
= control target key start
LH: loop header
LB: loop body
LE: loop exit
PB: predicated region body
PF: predicated region fallthrough
CT: control target
= control target key end

     0   :  { %8 = vsyncpa [#allocation3], 0  ;;  %s1363_s0 = inlined_call_operand.vmem [shape: f32[64,16], index: 0, kind: input, shape index: {}]   ;;  %s1364_s1 = inlined_call_operand.hbm [shape: bf16[528,128], index: 1, kind: input, shape index: {}]   ;;  %s1365_s2 = inlined_call_operand.vmem [shape: f32[5,128], index: 2, kind: input, shape index: {}]   ;;  %s1366_s3 = inlined_call_operand.hbm [shape: f32[64,128], index: 3, kind: output, shape index: {}]  }
   0x1   :  { %9 = vsyncpa [#allocation4], 0 }
   0x2   :  { %11 = vsyncpa [#allocation4 + $0x1], 0  ;;  %s1227_s12 = smov 0   ;;  %s1229_s13 = smov 0  }
   0x3   :  { %s1231_s14 = smov 0   ;;  %s1233_s15 = smov 0  }
   0x4 LB: > { %s1248_s16 = sadd.s32 4294967295, %s1199_s15   ;;  %s843_s17 = sadd.s32 4294967294, %s1199_s15   ;;  %s1199_s15 = sphi %s1233_s15, %s1374_s15   ;;  %s1195_s14 = sphi %s1231_s14, %s1373_s14   ;;  %s1191_s13 = sphi %s1229_s13, %s1372_s13   ;;  %s1187_s12 = sphi %s1227_s12, %s1371_s12  }
   0x5   : > { %s1252_s18 = sadd.s32 1, %s1199_s15   ;;  %s92_s19 = sadd.s32 1, %s1195_s14 }
   0x6   : > { %s89_s20 = ssub.s32 %s1199_s15, %s1252_s18  ;;  %p102_p0 = scmp.ne.s32.totalorder %s1195_s14, %s1191_s13 }
   0x7   : > { %p90_p1 = scmp.eq.s32.totalorder %s89_s20, 0  ;;  %p103_p2 = scmp.eq.s32.totalorder %s1248_s16, 1 }
   0x8   : > { %p108_p3 = scmp.ne.s32.totalorder %s1191_s13, %s1187_s12  ;;  %p109_p4 = scmp.eq.s32.totalorder %s843_s17, 1 }
   0x9   : > { %s1263_s21 = scalar_select %p90_p1, %s1195_s14, %s92_s19  }
   0xa   : > { %p1265_p5 = por %p103_p2, %p102_p0  ;;  %p1269_p6 = por %p109_p4, %p108_p3 }
   0xb   : > { %p844_p7 = scmp.ge.s32.totalorder %s1199_s15, 1  ;;  %p116_p8 = scmp.lt.s32.totalorder %s1199_s15, 3 }
   0xc   : > { %s1368_s23 = scalar_select %p1269_p6, 1, 0 }
   0xd   : > { %p1036_p9 = scmp.eq.s32.totalorder %s1248_s16, 0  ;;  %p1276_p10 = pnand %p844_p7, %p116_p8 }
   0xe   : > { %s1201_s25 = smov [#allocation2]  }
   0xf   : > { %s128_s26 = sshll.u32 %s1201_s25, 4  ;;  %p1028_p11 = pneg %p1276_p10  ;;  %s129_s26 = int_to_ptr.vmem [resolvable:$true] %s128_s26 }
  0x10   : > { %s1120_s27 = scalar_lea.vmem %s129_s26, 4224  ;;  %p1128_p3 = scmp.lt.s32.totalorder %s129_s26, %s129_s26 }
  0x11   : > { %p1029_p12 = pnand %p1036_p9, %p1028_p11  ;;  %p1121_p0 = scmp.ne.s32.totalorder %s129_s26, %s1120_s27 }
  0x12   : > { %p1129_p4 = scmp.lt.s32.totalorder %s1120_s27, %s1120_s27 }
  0x13   : > { %p1111_p13 = pneg %p1029_p12 }
  0x14   : > { %p1130_p6 = por %p1129_p4, %p1128_p3 }
  0x15   : > { %p1123_p1 = pnand %p1121_p0, %p1111_p13 }
  0x17   : > { %p1124_p2 = pneg %p1123_p1 }
  0x19   : > { %p1131_p7 = pnand %p1130_p6, %p1124_p2 }
  0x1b   : > { %1134 = shalt.err (!%p1131_p7)
}
  0x1c   : > { %s1202_s28 = smov 64   ;;  %s1203_s29 = smov 4  }
  0x1d   : > { %1031 = dma.hbm_to_vmem [thread:$0]  (!%p1029_p12), %s1364_s1, 4224, %s129_s26, [#allocation3], %s1202_s28, %s1202_s28, %s1203_s29  }
  0x1e   : > { %156 = sbr.rel (%p1276_p10) target bundleno = 1083 (0x43b), region = 32 }
  0x23   : > { %1178 = dma.done.wait (%p1036_p9), [#allocation3], 4224  }
  0x24   : > { %1180 = vsyncadd (%p1036_p9), [#allocation3], 4294963072  ;;  %s850_s5 = sshll.u32 %s1248_s16, 2  ;;  %v1076_v0 = vld [vmem:[#allocation2] sm:$0xff]   ;;  %vm207_vm0 = vcmask 130048   ;;  %v1078_v8 = vld [vmem:[#allocation2 + $0x38] sm:$0xff]   ;;  %v197_v20 = vlaneseq }
  0x25   : > { %p181_p8 = scmp.lt.s32.totalorder %s850_s5, 7  ;;  %936 = vmatprep.subr.bf16.mxu0 %v1076_v0  ;;  %v1077_v7 = vld [vmem:[#allocation2 + $0x40] sm:$0xff]   ;;  %v1079_v9 = vld [vmem:[#allocation2 + $0x30] sm:$0xff]   ;;  %v1080_v10 = vld [vmem:[#allocation2 + $0x28] sm:$0xff]   ;;  %s177_s17 = sand.u32 1, %s1191_s13  }
  0x26   : > { %937 = vmatpush3.bf16.msra.mxu0 %v1076_v0  ;;  %942 = vmatprep.subr.bf16.mxu1 %v1077_v7  ;;  %v1081_v11 = vld [vmem:[#allocation2 + $0x20] sm:$0xff]   ;;  %v1082_v12 = vld [vmem:[#allocation2 + $0x18] sm:$0xff]   ;;  %v1083_v13 = vld [vmem:[#allocation2 + $0x10] sm:$0xff]   ;;  %v1297_v21 = vshrl.u32 %v197_v20, 7  ;;  %s849_s19 = sshll.u32 %s177_s17, 5  ;;  %s892_s25 = sshll.u32 %s1248_s16, 9 }
  0x27   : > { %s1376_s5 = smov (!%p181_p8, %s850_s5), 7  ;;  %943 = vmatpush3.bf16.msra.mxu1 %v1077_v7  ;;  %v1084_v14 = vld [vmem:[#allocation2 + $0x8] sm:$0xff]   ;;  %v1085_v15 = vld [vmem:[#allocation2 + $0x80] sm:$0xff]   ;;  %v1086_v16 = vld [vmem:[#allocation2 + $0x78] sm:$0xff]   ;;  %s179_s20 = scalar_lea.vmem [#allocation5], %s849_s19 }
  0x28   : > { %s851_s6 = sshll.u32 %s1376_s5, 3  ;;  %944 = vmatprep.subr.bf16.mxu1 %v1078_v8  ;;  %962 = vmatprep.subr.bf16.mxu0 %v1085_v15  ;;  %v1087_v17 = vld [vmem:[#allocation2 + $0x70] sm:$0xff]   ;;  %v1088_v18 = vld [vmem:[#allocation2 + $0x68] sm:$0xff]   ;;  %v1089_v19 = vld [vmem:[#allocation2 + $0x60] sm:$0xff]   ;;  %v199_v22 = vsub.s32 0, %v1297_v21  ;;  %v287_v47 = vsub.s32 1, %v1297_v21  ;;  %s1321_s28 = scalar_lea.hbm %s1366_s3, %s892_s25 }
  0x29   : > { %s184_s9 = scalar_lea.vmem %s1363_s0, %s851_s6  ;;  %v1303_v23 = vld [vmem:[%s1365_s2] sm:$0x1f]  ;;  %v1090_v39 = vld [vmem:[#allocation2 + $0x58] sm:$0xff]   ;;  %v1091_v40 = vld [vmem:[#allocation2 + $0x50] sm:$0xff]   ;;  %v410_v7 = vsub.s32 2, %v1297_v21  ;;  %s769_s24 = sshll.u32 %s179_s20, 4  ;;  %s1316_s24 = int_to_ptr.vmem [resolvable:$true] %s769_s24 }
  0x2a   : > { %v188_v1 = vld [vmem:[%s184_s9] sm:$0xff]  ;;  %v189_v2 = vld [vmem:[%s184_s9 + $0x8] sm:$0xff]  ;;  %v190_v3 = vld [vmem:[%s184_s9 + $0x10] sm:$0xff]  ;;  %v200_v25 = vrot.slane %v1303_v23, %v199_v22  ;;  %v288_v49 = vrot.slane %v1303_v23, %v287_v47  ;;  %s1323_s29 = scalar_lea.sflag [#allocation4], %s177_s17  ;;  %s1135_s16 = scalar_lea.vmem %s1316_s24, 512 }
  0x2b   : > { %v195_v4 = vpack.c.bf16 %v189_v2, %v188_v1  ;;  %v191_v5 = vld [vmem:[%s184_s9 + $0x18] sm:$0xff]  ;;  %945 = vmatpush3.bf16.msra.mxu1 %v1078_v8  ;;  %v1092_v41 = vld [vmem:[#allocation2 + $0x48] sm:$0xff]   ;;  %v1093_v42 = vld [vmem:[#allocation2 + $0xc0] sm:$0xff]   ;;  %p1136_p6 = scmp.ne.s32.totalorder %s1316_s24, %s1135_s16  ;;  %s1204_s30 = smov [#allocation5]  }
  0x2c   : > { %v196_v6 = vpack.c.bf16 %v191_v5, %v190_v3  ;;  %946 = vmatprep.subr.bf16.mxu1 %v1079_v9  ;;  %v1094_v43 = vld [vmem:[#allocation2 + $0xb8] sm:$0xff]   ;;  %v1095_v44 = vld [vmem:[#allocation2 + $0xb0] sm:$0xff]   ;;  %v1096_v45 = vld [vmem:[#allocation2 + $0xa8] sm:$0xff]   ;;  %s1139_s4 = sshll.u32 %s1204_s30, 4  ;;  %s1140_s4 = int_to_ptr.vmem [resolvable:$false] %s1139_s4 }
  0x2d   : > { %938 = vmatprep.mubr.msk.bf16.mxu0 %vm207_vm0, %v195_v4  ;;  %v1097_v46 = vld [vmem:[#allocation2 + $0xa0] sm:$0xff]   ;;  %v1098_v63 = vld [vmem:[#allocation2 + $0x98] sm:$0xff]   ;;  %v1099_v0 = vld [vmem:[#allocation2 + $0x90] sm:$0xff]   ;;  %p1137_p9 = pnand %p1136_p6, %p1265_p5  ;;  %s1141_s5 = scalar_lea.vmem %s1140_s4, 1024 }
  0x2e   : > { %939 = vmatmul.mubr.msk.bf16.vlgmr.msra.gmra.mxu0 %vm207_vm0, %v196_v6  ;;  %v1100_v1 = vld [vmem:[#allocation2 + $0x88] sm:$0xff]   ;;  %v1101_v2 = vld [vmem:[#allocation2 + $0x100] sm:$0xff]   ;;  %v1102_v3 = vld [vmem:[#allocation2 + $0xf8] sm:$0xff]   ;;  %p1142_p11 = scmp.lt.s32.totalorder %s1316_s24, %s1140_s4  ;;  %p1143_p12 = scmp.lt.s32.totalorder %s1141_s5, %s1135_s16 }
  0x2f   : > { %947 = vmatpush3.bf16.msra.mxu1 %v1079_v9  ;;  %963 = vmatpush3.bf16.msra.mxu0 %v1085_v15  ;;  %v1103_v4 = vld [vmem:[#allocation2 + $0xf0] sm:$0xff]   ;;  %v1104_v5 = vld [vmem:[#allocation2 + $0xe8] sm:$0xff]   ;;  %v1105_v6 = vld [vmem:[#allocation2 + $0xe0] sm:$0xff]   ;;  %p1138_p10 = pneg %p1137_p9 }
  0x30   : > { %948 = vmatprep.subr.bf16.mxu1 %v1080_v10  ;;  %964 = vmatprep.subr.bf16.mxu0 %v1086_v16  ;;  %v1107_v20 = vld [vmem:[#allocation2 + $0xd0] sm:$0xff]   ;;  %v1108_v22 = vld [vmem:[#allocation2 + $0xc8] sm:$0xff]   ;;  %p1144_p13 = por %p1143_p12, %p1142_p11 }
  0x32   : > { %p1145_p0 = pnand %p1144_p13, %p1138_p10 }
  0x33   : > { %949 = vmatpush3.bf16.msra.mxu1 %v1080_v10  ;;  %965 = vmatpush3.bf16.msra.mxu0 %v1086_v16  ;;  %v411_v10 = vrot.slane %v1303_v23, %v410_v7 }
  0x34   : > { %950 = vmatprep.subr.bf16.mxu1 %v1081_v11  ;;  %966 = vmatprep.subr.bf16.mxu0 %v1087_v17 }
  0x37   : > { %951 = vmatpush3.bf16.msra.mxu1 %v1081_v11  ;;  %967 = vmatpush3.bf16.msra.mxu0 %v1087_v17 }
  0x38   : > { %952 = vmatprep.subr.bf16.mxu1 %v1082_v12  ;;  %968 = vmatprep.subr.bf16.mxu0 %v1088_v18 }
  0x3b   : > { %953 = vmatpush3.bf16.msra.mxu1 %v1082_v12  ;;  %969 = vmatpush3.bf16.msra.mxu0 %v1088_v18 }
  0x3c   : > { %954 = vmatprep.subr.bf16.mxu1 %v1083_v13  ;;  %970 = vmatprep.subr.bf16.mxu0 %v1089_v19 }
  0x3f   : > { %955 = vmatpush3.bf16.msra.mxu1 %v1083_v13  ;;  %971 = vmatpush3.bf16.msra.mxu0 %v1089_v19  ;;  %v1106_v19 = vld [vmem:[#allocation2 + $0xd8] sm:$0xff]  }
  0x40   : > { %956 = vmatprep.subr.bf16.mxu1 %v1084_v14  ;;  %972 = vmatprep.subr.bf16.mxu0 %v1090_v39 }
  0x43   : > { %957 = vmatpush3.bf16.msra.mxu1 %v1084_v14  ;;  %973 = vmatpush3.bf16.msra.mxu0 %v1090_v39 }
  0x44   : > { %974 = vmatprep.subr.bf16.mxu0 %v1091_v40  ;;  %982 = vmatprep.subr.bf16.mxu1 %v1093_v42 }
  0x47   : > { %975 = vmatpush3.bf16.msra.mxu0 %v1091_v40  ;;  %v652_v40 = vsub.s32 4, %v1297_v21 }
  0x48   : > { %976 = vmatprep.subr.bf16.mxu0 %v1092_v41 }
  0x4b   : > { %977 = vmatpush3.bf16.msra.mxu0 %v1092_v41  ;;  %v653_v41 = vrot.slane %v1303_v23, %v652_v40 }
  0x4c   : > { %1002 = vmatprep.subr.bf16.mxu0 %v1101_v2 }
  0xee   : > { %v940_v24 = vpop.f32.mrf.mxu0 }
  0xef   : > { %v257_v30 = vadd.f32 %v940_v24, %v200_v25  ;;  %v529_v24 = vsub.s32 3, %v1297_v21 }
  0xf0   : > { %v248_v26 = vpop.f32.mrf.mxu0 }
  0xf1   : > { %v249_v28 = vadd.f32 %v248_v26, %v200_v25  ;;  %v265_v36 = vmax.f32 %v257_v30, 0.0  ;;  %v530_v26 = vrot.slane %v1303_v23, %v529_v24 }
  0xf2   : > { %v941_v27 = vpop.f32.mrf.mxu0 }
  0xf3   : > { %v260_v29 = vadd.f32 %v941_v27, %v200_v25  ;;  %v263_v34 = vmax.f32 %v249_v28, 0.0 }
  0xf4   : > { %v251_v31 = vpop.f32.mrf.mxu0 }
  0xf5   : > { %v252_v32 = vadd.f32 %v251_v31, %v200_v25  ;;  %v266_v33 = vmax.f32 %v260_v29, 0.0 }
  0xf7   : > { %v264_v35 = vmax.f32 %v252_v32, 0.0  ;;  %v284_v38 = vpack.c.bf16 %v266_v33, %v265_v36 }
  0xf9   : > { %v283_v37 = vpack.c.bf16 %v264_v35, %v263_v34 }
  0xfb   : > { %958 = vmatprep.mubr.bf16.mxu1 %v283_v37 }
  0xfc   : > { %959 = vmatmul.mubr.bf16.vlgmr.msra.gmra.mxu1 %v284_v38 }
  0xfd   : > { %983 = vmatpush3.bf16.msra.mxu1 %v1093_v42 }
  0xfe   : > { %984 = vmatprep.subr.bf16.mxu1 %v1094_v43 }
 0x101   : > { %985 = vmatpush3.bf16.msra.mxu1 %v1094_v43 }
 0x102   : > { %986 = vmatprep.subr.bf16.mxu1 %v1095_v44 }
 0x105   : > { %987 = vmatpush3.bf16.msra.mxu1 %v1095_v44 }
 0x106   : > { %988 = vmatprep.subr.bf16.mxu1 %v1096_v45 }
 0x109   : > { %989 = vmatpush3.bf16.msra.mxu1 %v1096_v45 }
 0x10a   : > { %990 = vmatprep.subr.bf16.mxu1 %v1097_v46 }
 0x10d   : > { %991 = vmatpush3.bf16.msra.mxu1 %v1097_v46 }
 0x10e   : > { %992 = vmatprep.subr.bf16.mxu1 %v1098_v63 }
 0x111   : > { %993 = vmatpush3.bf16.msra.mxu1 %v1098_v63 }
 0x112   : > { %994 = vmatprep.subr.bf16.mxu1 %v1099_v0 }
 0x115   : > { %995 = vmatpush3.bf16.msra.mxu1 %v1099_v0 }
 0x116   : > { %996 = vmatprep.subr.bf16.mxu1 %v1100_v1 }
 0x119   : > { %997 = vmatpush3.bf16.msra.mxu1 %v1100_v1 }
 0x1bc   : > { %v960_v48 = vpop.f32.mrf.mxu1 }
 0x1bd   : > { %v380_v54 = vadd.f32 %v960_v48, %v288_v49 }
 0x1be   : > { %v371_v50 = vpop.f32.mrf.mxu1 }
 0x1bf   : > { %v372_v52 = vadd.f32 %v371_v50, %v288_v49  ;;  %v388_v60 = vmax.f32 %v380_v54, 0.0 }
 0x1c0   : > { %v961_v51 = vpop.f32.mrf.mxu1 }
 0x1c1   : > { %v383_v53 = vadd.f32 %v961_v51, %v288_v49  ;;  %v386_v58 = vmax.f32 %v372_v52, 0.0 }
 0x1c2   : > { %v374_v55 = vpop.f32.mrf.mxu1 }
 0x1c3   : > { %v375_v56 = vadd.f32 %v374_v55, %v288_v49  ;;  %v389_v57 = vmax.f32 %v383_v53, 0.0 }
 0x1c5   : > { %v387_v59 = vmax.f32 %v375_v56, 0.0  ;;  %v407_v62 = vpack.c.bf16 %v389_v57, %v388_v60 }
 0x1c7   : > { %v406_v61 = vpack.c.bf16 %v387_v59, %v386_v58 }
 0x1c9   : > { %978 = vmatprep.mubr.bf16.mxu0 %v406_v61 }
 0x1ca   : > { %979 = vmatmul.mubr.bf16.vlgmr.msra.gmra.mxu0 %v407_v62 }
 0x1cb   : > { %1003 = vmatpush3.bf16.msra.mxu0 %v1101_v2 }
 0x1cc   : > { %1004 = vmatprep.subr.bf16.mxu0 %v1102_v3 }
 0x1cf   : > { %1005 = vmatpush3.bf16.msra.mxu0 %v1102_v3 }
 0x1d0   : > { %1006 = vmatprep.subr.bf16.mxu0 %v1103_v4 }
 0x1d3   : > { %1007 = vmatpush3.bf16.msra.mxu0 %v1103_v4 }
 0x1d4   : > { %1008 = vmatprep.subr.bf16.mxu0 %v1104_v5 }
 0x1d7   : > { %1009 = vmatpush3.bf16.msra.mxu0 %v1104_v5 }
 0x1d8   : > { %1010 = vmatprep.subr.bf16.mxu0 %v1105_v6 }
 0x1db   : > { %1011 = vmatpush3.bf16.msra.mxu0 %v1105_v6 }
 0x1dc   : > { %1012 = vmatprep.subr.bf16.mxu0 %v1106_v19 }
 0x1df   : > { %1013 = vmatpush3.bf16.msra.mxu0 %v1106_v19 }
 0x1e0   : > { %1014 = vmatprep.subr.bf16.mxu0 %v1107_v20 }
 0x1e3   : > { %1015 = vmatpush3.bf16.msra.mxu0 %v1107_v20 }
 0x1e4   : > { %1016 = vmatprep.subr.bf16.mxu0 %v1108_v22 }
 0x1e7   : > { %1017 = vmatpush3.bf16.msra.mxu0 %v1108_v22 }
 0x28a   : > { %v980_v8 = vpop.f32.mrf.mxu0 }
 0x28b   : > { %v503_v16 = vadd.f32 %v980_v8, %v411_v10 }
 0x28c   : > { %v494_v9 = vpop.f32.mrf.mxu0 }
 0x28d   : > { %v495_v14 = vadd.f32 %v494_v9, %v411_v10 }
 0x28e   : > { %v981_v11 = vpop.f32.mrf.mxu0 }
 0x28f   : > { %v506_v12 = vadd.f32 %v981_v11, %v411_v10 }
 0x290   : > { %v497_v13 = vpop.f32.mrf.mxu0 }
 0x291   : > { %v498_v15 = vadd.f32 %v497_v13, %v411_v10  ;;  %v526_v18 = vpack.c.bf16 %v506_v12, %v503_v16 }
 0x293   : > { %v525_v17 = vpack.c.bf16 %v498_v15, %v495_v14 }
 0x295   : > { %998 = vmatprep.mubr.bf16.mxu1 %v525_v17 }
 0x296   : > { %999 = vmatmul.mubr.bf16.vlgmr.msra.gmra.mxu1 %v526_v18 }
 0x356   : > { %v1000_v25 = vpop.f32.mrf.mxu1 }
 0x357   : > { %v622_v31 = vadd.f32 %v1000_v25, %v530_v26 }
 0x358   : > { %v613_v27 = vpop.f32.mrf.mxu1 }
 0x359   : > { %v614_v29 = vadd.f32 %v613_v27, %v530_v26  ;;  %v630_v37 = vmax.f32 %v622_v31, 0.0 }
 0x35a   : > { %v1001_v28 = vpop.f32.mrf.mxu1 }
 0x35b   : > { %v625_v30 = vadd.f32 %v1001_v28, %v530_v26  ;;  %v628_v35 = vmax.f32 %v614_v29, 0.0 }
 0x35c   : > { %v616_v32 = vpop.f32.mrf.mxu1 }
 0x35d   : > { %v617_v33 = vadd.f32 %v616_v32, %v530_v26  ;;  %v631_v34 = vmax.f32 %v625_v30, 0.0 }
 0x35f   : > { %v629_v36 = vmax.f32 %v617_v33, 0.0  ;;  %v649_v39 = vpack.c.bf16 %v631_v34, %v630_v37 }
 0x361   : > { %v648_v38 = vpack.c.bf16 %v629_v36, %v628_v35 }
 0x363   : > { %1018 = vmatprep.mubr.bf16.mxu0 %v648_v38 }
 0x364   : > { %1019 = vmatmul.mubr.bf16.vlgmr.msra.gmra.mxu0 %v649_v39 }
 0x424   : > { %v1020_v42 = vpop.f32.mrf.mxu0 }
 0x425   : > { %v745_v43 = vadd.f32 %v1020_v42, %v653_v41 }
 0x426   : > { %v736_v44 = vpop.f32.mrf.mxu0 }
 0x427   : > { %753 = vst [vmem:[%s179_s20 + $0x10] sm:$0xff] %v745_v43  ;;  %v737_v45 = vadd.f32 %v736_v44, %v653_v41 }
 0x428   : > { %v1021_v46 = vpop.f32.mrf.mxu0 }
 0x429   : > { %751 = vst [vmem:[%s179_s20] sm:$0xff] %v737_v45  ;;  %v748_v47 = vadd.f32 %v1021_v46, %v653_v41 }
 0x42a   : > { %v739_v21 = vpop.f32.mrf.mxu0 }
 0x42b   : > { %754 = vst [vmem:[%s179_s20 + $0x18] sm:$0xff] %v748_v47  ;;  %v740_v23 = vadd.f32 %v739_v21, %v653_v41 }
 0x42d   : > { %752 = vst [vmem:[%s179_s20 + $0x8] sm:$0xff] %v740_v23 }
 0x42e   : > { %1148 = shalt.err (!%p1145_p0)
}
 0x42f   : > { %s1149_s6 = scalar_lea.hbm %s1321_s28, 512  ;;  %s1153_s9 = scalar_lea.hbm %s1366_s3, 1024 }
 0x430   : > { %p1150_p1 = scmp.ne.s32.totalorder %s1321_s28, %s1149_s6  ;;  %p1154_p4 = scmp.lt.s32.totalorder %s1321_s28, %s1366_s3 }
 0x431   : > { %p1155_p7 = scmp.lt.s32.totalorder %s1153_s9, %s1149_s6 }
 0x432   : > { %p1151_p2 = pnand %p1150_p1, %p1265_p5 }
 0x433   : > { %p1156_p8 = por %p1155_p7, %p1154_p4 }
 0x434   : > { %p1152_p3 = pneg %p1151_p2 }
 0x436   : > { %p1157_p6 = pnand %p1156_p8, %p1152_p3 }
 0x438   : > { %1160 = shalt.err (!%p1157_p6)
}
 0x439   : > { %s1205_s17 = smov 128   ;;  %s1206_s19 = smov 8  }
 0x43a   : > { %1026 = dma.vmem_to_hbm [thread:$0]  (%p1265_p5), %s1316_s24, 512, %s1321_s28, %s1323_s29, %s1205_s17, %s1205_s17, %s1206_s19  }
 0x43b PF: > { %p1038_p9 = scmp.ge.s32.totalorder %s1199_s15, 2  ;;  %s784_s20 = sand.u32 1, %s1187_s12  }
 0x43c   : > { %p1370_p10 = scmp.ne.s32.totalorder %s1368_s23, 0  ;;  %s785_s25 = scalar_lea.sflag [#allocation4], %s784_s20 }
 0x43e   : > { %p1033_p11 = pnand %p1038_p9, %p1370_p10 }
 0x440   : > { %p1034_p12 = pneg %p1033_p11 }
 0x442   : > { %1182 = dma.done.wait (%p1034_p12), %s785_s25, 512  }
 0x443   : > { %1184 = vsyncadd (%p1034_p12), %s785_s25, 4294966784  ;;  %p14_p13 = scmp.ge.s32.totalorder %s1252_s18, 4   ;;  %s1371_s12 = smov %s1191_s13 }
 0x444   : > { %s1372_s13 = smov %s1195_s14  ;;  %s1373_s14 = smov %s1263_s21 }
 0x445   : > { %s1374_s15 = smov %s1252_s18  ;;  %16 = sbr.rel (!%p14_p13) target bundleno = 4 (0x4), region = 72 }
 0x44a   :  { %790 = vsyncpa [#allocation3], 1 }
 0x44b   :  { %792 = vsyncpa [#allocation3 + $0x1], 1 }
 0x44c   :  { %793 = vsyncpa [#allocation4], 1 }
 0x44d   :  { %795 = vsyncpa [#allocation4 + $0x1], 1 }

</bundles_post_ra>
